<compile_context>
chip_gen: v7x
topology: tpu7x:2x2x1
jax: 0.10.0
libtpu: 0.0.40
codegen_flags: <defaults>
</compile_context>

<pallas_src>
import jax
import jax.numpy as jnp
from jax.experimental import pallas as pl
from jax.experimental.pallas import tpu as pltpu


def _round_up(x, m):
    return ((x + m - 1) // m) * m


def _block_spec(shape, index_map, buffer_count=None):
    """BlockSpec with optional pipeline_mode=pl.Buffered(n); falls back cleanly
    if this jax version's BlockSpec has no pipeline_mode kwarg."""
    if buffer_count is not None and hasattr(pl, "Buffered"):
        try:
            return pl.BlockSpec(shape, index_map,
                                pipeline_mode=pl.Buffered(buffer_count))
        except (TypeError, AttributeError):
            pass
    return pl.BlockSpec(shape, index_map)


def _tpu_memory_profile():
    """Returns (vmem_budget_bytes, vmem_limit_bytes, multi_core) per TPU gen."""
    try:
        kind = jax.devices()[0].device_kind.lower()
    except Exception:  # pragma: no cover - defensive
        kind = ""
    mib = 1024 * 1024
    if "v7" in kind:
        # v7x: 64 MiB VMEM per TensorCore, 2 TensorCores per chip.
        return 40 * mib, 48 * mib, True
    if any(s in kind for s in ("v4", "v5", "v6")):
        # 128 MiB physical VMEM; raise the scoped limit well past the default.
        multi = ("v4" in kind) or ("v5p" in kind)  # megacore generations
        return 96 * mib, 112 * mib, multi
    # Unknown / future chip: conservative (v7x-safe) numbers.
    return 40 * mib, 48 * mib, True


def _make_pglu_kernel(matmul_dtype):
    def kernel(x_ref, w_ref, b_ref, pot_ref, decay_ref, act_ref, pot_new_ref):
        x = x_ref[...]
        w = w_ref[...]
        if matmul_dtype is not None:
            # Cast only the MXU operands, in-kernel (no wrapper HBM round trip);
            # bias / potential / decay math stays in f32.
            x = x.astype(matmul_dtype)
            w = w.astype(matmul_dtype)
        new_x = jnp.dot(x, w, preferred_element_type=jnp.float32)
        potential = (pot_ref[...].astype(jnp.float32) + new_x
                     + b_ref[...].astype(jnp.float32))
        act_ref[...] = jnp.maximum(potential, 0.0).astype(act_ref.dtype)
        # potential - relu(potential) == min(potential, 0)   (one fewer VPU op)
        pot_new_ref[...] = (jnp.minimum(potential, 0.0)
                            * decay_ref[...].astype(jnp.float32)
                            ).astype(pot_new_ref.dtype)
    return kernel


def pglu_forward(x, w, b, potential, decay_rate, *,
                 block_m=None, block_n=None,
                 matmul_dtype=None, act_dtype=None):
    """x: (B, I), w: (I, O), b: (O,), potential: (B, O), decay_rate: (O,).

    matmul_dtype: optional narrower dtype (e.g. bf16) for the MXU operands
      (cast happens inside the kernel; accumulation stays f32).
    act_dtype: optional dtype for the 'activated' output (e.g. bf16) to cut
      output write traffic; potential_new keeps potential's dtype.
    """
    B, I = x.shape
    I_w, O = w.shape
    assert I_w == I, "weight shape mismatch"
    assert potential.shape == (B, O)
    assert b.shape == (O,) and decay_rate.shape == (O,)

    act_dtype = jnp.dtype(x.dtype if act_dtype is None else act_dtype)
    pot_dtype = jnp.dtype(potential.dtype)

    vmem_budget, vmem_limit, multi_core = _tpu_memory_profile()

    x_item = jnp.dtype(x.dtype).itemsize
    w_item = jnp.dtype(w.dtype).itemsize
    b_item = jnp.dtype(b.dtype).itemsize
    d_item = jnp.dtype(decay_rate.dtype).itemsize
    pot_item = pot_dtype.itemsize
    act_item = act_dtype.itemsize

    # Sublane alignment of the row tile: 8 for 4-byte refs, 16 for 2-byte, ...
    def _sub(itemsize):
        return max(8, 32 // itemsize)
    m_align = max(_sub(x_item), _sub(pot_item), _sub(act_item))

    def step_vmem_bytes(bm, bn, w_bufs):
        # Per-pipeline-step working set (actual itemsizes, actual buffer counts).
        return (2 * bm * I * x_item                      # x tile (double-buffered)
                + w_bufs * I * bn * w_item               # W tile
                + 2 * bn * (b_item + d_item)             # bias / decay rows
                + 2 * bm * bn * pot_item                 # potential (in)
                + 2 * bm * bn * act_item                 # activated (out)
                + 2 * bm * bn * pot_item)                # potential_new (out)

    # ---- row tile (block_m): target 512, keep >=2 grid steps on 2-TC chips ----
    auto_m = block_m is None
    if auto_m:
        block_m = min(512, _round_up(B, m_align))
        if multi_core and B >= 2 * m_align and pl.cdiv(B, block_m) < 2:
            block_m = _round_up(pl.cdiv(B, 2), m_align)
    block_m = max(m_align, _round_up(block_m, m_align))

    # ---- output tile (block_n): prefer fully-resident, single-buffered W ----
    if block_n is None:
        block_n = O
        if step_vmem_bytes(block_m, O, 1) > vmem_budget and O > 128:
            for bn in (1024, 512, 256, 128):
                if bn <= O and step_vmem_bytes(block_m, bn, 2) <= vmem_budget:
                    block_n = bn
                    break
            else:
                block_n = 128
    else:
        block_n = min(block_n, O)

    w_bufs = 1 if block_n >= O else 2
    if auto_m:
        # Last resort: shrink the row tile until the working set fits.
        while (block_m > m_align
               and step_vmem_bytes(block_m, block_n, w_bufs) > vmem_budget):
            block_m = max(m_align, _round_up(block_m // 2, m_align))

    num_m = pl.cdiv(B, block_m)
    num_n = pl.cdiv(O, block_n)

    # W / bias / decay are grid-invariant only when there is no N tiling;
    # then a single buffer suffices (fetched once, reused every step).
    invariant_bufs = 1 if num_n == 1 else None

    b2 = b.reshape(1, O)
    d2 = decay_rate.reshape(1, O)

    in_specs = [
        _block_spec((block_m, I), lambda m, n: (m, 0)),                    # x
        _block_spec((I, block_n), lambda m, n: (0, n), invariant_bufs),    # W
        _block_spec((1, block_n), lambda m, n: (0, n), invariant_bufs),    # bias
        _block_spec((block_m, block_n), lambda m, n: (m, n)),              # potential
        _block_spec((1, block_n), lambda m, n: (0, n), invariant_bufs),    # decay
    ]
    out_specs = [
        pl.BlockSpec((block_m, block_n), lambda m, n: (m, n)),             # activated
        pl.BlockSpec((block_m, block_n), lambda m, n: (m, n)),             # potential_new
    ]

    out_shapes = (
        jax.ShapeDtypeStruct((B, O), act_dtype),
        jax.ShapeDtypeStruct((B, O), pot_dtype),
    )

    bytes_accessed = int(
        x.size * x_item + w.size * w_item + b.size * b_item
        + potential.size * pot_item + decay_rate.size * d_item
        + B * O * (act_item + pot_item))
    cost = pl.CostEstimate(flops=2 * B * I * O, transcendentals=0,
                           bytes_accessed=bytes_accessed)

    act, pot_new = pl.pallas_call(
        _make_pglu_kernel(matmul_dtype),
        out_shape=out_shapes,
        grid_spec=pltpu.PrefetchScalarGridSpec(
            num_scalar_prefetch=0,
            grid=(num_m, num_n),
            in_specs=in_specs,
            out_specs=out_specs,
        ),
        # potential (input 3) aliases potential_new (output 1): in-place update
        # of the caller's buffer (no pad copy in between anymore).
        input_output_aliases={3: 1},
        cost_estimate=cost,
        compiler_params=pltpu.CompilerParams(
            dimension_semantics=("parallel", "parallel"),
            vmem_limit_bytes=vmem_limit,
        ),
    )(x, w, b2, potential, d2)

    return act, pot_new


def scaled_bell_distribution_capped_at_2_times_sigma(hidden_size, center, sigma):
    """Deterministic stand-in for the init helper: Gaussian bell-shaped values
    over the hidden dimension, scaled around `center`, capped at center +/- 2*sigma."""
    idx = jnp.arange(hidden_size, dtype=jnp.float32)
    mid = (hidden_size - 1) / 2.0
    bell = jnp.exp(-0.5 * ((idx - mid) / (hidden_size / 6.0)) ** 2)  # in (0, 1]
    vals = center + sigma * (2.0 * bell - 1.0)
    return jnp.clip(vals, center - 2.0 * sigma, center + 2.0 * sigma)


def pglu_reference(x, w, b, potential, decay_rate):
    new_x = x @ w + b
    pot = potential + new_x
    act = jnp.maximum(pot, 0.0)
    pot_new = (pot - act) * decay_rate
    return act, pot_new


def _make_inputs(key, batch, input_size, output_size, hidden_size,
                 init_decay_center=0.9, init_decay_sigma=0.05):
    kx, kp, kw, kb = jax.random.split(key, 4)
    x = jax.random.normal(kx, (batch, input_size), dtype=jnp.float32)
    potential = jax.random.normal(kp, (batch, output_size), dtype=jnp.float32)
    bound = 1.0 / (input_size ** 0.5)
    # nn.Linear-style init; W stored as (in, out) == PyTorch W.T.
    w = jax.random.uniform(kw, (input_size, output_size), dtype=jnp.float32,
                           minval=-bound, maxval=bound)
    b = jax.random.uniform(kb, (output_size,), dtype=jnp.float32,
                           minval=-bound, maxval=bound)
    decay = scaled_bell_distribution_capped_at_2_times_sigma(
        hidden_size, init_decay_center, init_decay_sigma)
    return x, w, b, potential, decay


if __name__ == "__main__":
    key = jax.random.PRNGKey(0)
    k1, k2 = jax.random.split(key)

    # --- Test 1: shapes implied by the module (input=output=hidden), exact f32 ---
    batch, input_size, output_size, hidden_size = 8, 32, 32, 32
    x, w, b, potential, decay = _make_inputs(k1, batch, input_size,
                                             output_size, hidden_size)
    act_ref, pot_ref = pglu_reference(x, w, b, potential, decay)

    activated, potential_new = pglu_forward(x, w, b, potential, decay)
    jax.block_until_ready((activated, potential_new))
    assert activated.shape == (batch, output_size)
    assert potential_new.shape == (batch, output_size)
    assert jnp.allclose(activated, act_ref, atol=1e-5, rtol=1e-5)
    assert jnp.allclose(potential_new, pot_ref, atol=1e-5, rtol=1e-5)

    # --- Test 2: bf16 MXU operands (in-kernel cast, f32 accumulation) ---
    act_bf16, pot_bf16 = pglu_forward(x, w, b, potential, decay,
                                      matmul_dtype=jnp.bfloat16)
    jax.block_until_ready((act_bf16, pot_bf16))
    assert jnp.allclose(act_bf16, act_ref, atol=5e-2, rtol=5e-2)
    assert jnp.allclose(pot_bf16, pot_ref, atol=5e-2, rtol=5e-2)

    # --- Test 3: ragged batch + forced N tiling + bf16 activated output ---
    B2, I2, O2 = 37, 160, 384
    x2, w2, b2, p2, d2 = _make_inputs(k2, B2, I2, O2, O2)
    act_ref2, pot_ref2 = pglu_reference(x2, w2, b2, p2, d2)
    act2, pot2 = pglu_forward(x2, w2, b2, p2, d2,
                              block_m=16, block_n=128,
                              act_dtype=jnp.bfloat16)
    jax.block_until_ready((act2, pot2))
    assert act2.shape == (B2, O2) and pot2.shape == (B2, O2)
    assert act2.dtype == jnp.bfloat16
    assert jnp.allclose(act2.astype(jnp.float32), act_ref2, atol=5e-2, rtol=5e-2)
    assert jnp.allclose(pot2, pot_ref2, atol=1e-4, rtol=1e-4)

    print("KERNEL_OK")
</pallas_src>

<mosaic_0001>
module attributes {stable_mosaic.version = 11 : i64} {
  func.func @kernel(%arg0: i32, %arg1: i32, %arg2: memref<8x32xf32, #tpu.memory_space<vmem>>, %arg3: memref<32x32xf32, #tpu.memory_space<vmem>>, %arg4: memref<1x32xf32, #tpu.memory_space<vmem>>, %arg5: memref<8x32xf32, #tpu.memory_space<vmem>>, %arg6: memref<1x32xf32, #tpu.memory_space<vmem>>, %arg7: memref<8x32xf32, #tpu.memory_space<vmem>>, %arg8: memref<8x32xf32, #tpu.memory_space<vmem>>) attributes {dimension_semantics = [#tpu.dimension_semantics<parallel>, #tpu.dimension_semantics<parallel>], iteration_bounds = array<i64: 1, 1>, scalar_prefetch = 0 : i64, scratch_operands = 0 : i64, tpu.core_type = #tpu.core_type<tc>, window_params = [{transform_indices = @transform_0, window_bounds = array<i64: 8, 32>}, {pipeline_mode = #tpu.pipeline_mode<synchronous>, transform_indices = @transform_1, window_bounds = array<i64: 32, 32>}, {pipeline_mode = #tpu.pipeline_mode<synchronous>, transform_indices = @transform_2, window_bounds = array<i64: 1, 32>}, {transform_indices = @transform_3, window_bounds = array<i64: 8, 32>}, {pipeline_mode = #tpu.pipeline_mode<synchronous>, transform_indices = @transform_4, window_bounds = array<i64: 1, 32>}, {transform_indices = @transform_5, window_bounds = array<i64: 8, 32>}, {transform_indices = @transform_6, window_bounds = array<i64: 8, 32>}]} {
    %c0 = arith.constant 0 : index
    %c0_0 = arith.constant 0 : index
    %0 = vector.load %arg2[%c0, %c0_0] : memref<8x32xf32, #tpu.memory_space<vmem>>, vector<8x32xf32>
    %c0_1 = arith.constant 0 : index
    %c0_2 = arith.constant 0 : index
    %1 = vector.load %arg3[%c0_1, %c0_2] : memref<32x32xf32, #tpu.memory_space<vmem>>, vector<32x32xf32>
    %cst = arith.constant dense<0.000000e+00> : vector<8x32xf32>
    %2 = tpu.matmul %0, %1, %cst {dimension_numbers = #tpu.dot_dimension_numbers<[1], [0], [0], [1], [0, 0, 1, 1], [], []>} : vector<8x32xf32>, vector<32x32xf32>, vector<8x32xf32> -> vector<8x32xf32>
    %c0_3 = arith.constant 0 : index
    %c0_4 = arith.constant 0 : index
    %3 = vector.load %arg5[%c0_3, %c0_4] : memref<8x32xf32, #tpu.memory_space<vmem>>, vector<8x32xf32>
    %4 = arith.addf %3, %2 : vector<8x32xf32>
    %c0_5 = arith.constant 0 : index
    %c0_6 = arith.constant 0 : index
    %5 = vector.load %arg4[%c0_5, %c0_6] : memref<1x32xf32, #tpu.memory_space<vmem>>, vector<1x32xf32>
    %6 = vector.broadcast %5 : vector<1x32xf32> to vector<8x32xf32>
    %7 = arith.addf %4, %6 : vector<8x32xf32>
    %cst_7 = arith.constant 0.000000e+00 : f32
    %8 = vector.broadcast %cst_7 : f32 to vector<8x32xf32>
    %9 = arith.maximumf %7, %8 : vector<8x32xf32>
    %c0_8 = arith.constant 0 : index
    %c0_9 = arith.constant 0 : index
    %10 = vector.load %arg7[%c0_8, %c0_9] : memref<8x32xf32, #tpu.memory_space<vmem>>, vector<8x32xf32>
    tpu.vector_store %arg7[%c0_8, %c0_9], %9 {strides = array<i32>} : memref<8x32xf32, #tpu.memory_space<vmem>>, vector<8x32xf32>,
    %cst_10 = arith.constant 0.000000e+00 : f32
    %11 = vector.broadcast %cst_10 : f32 to vector<8x32xf32>
    %12 = arith.minimumf %7, %11 : vector<8x32xf32>
    %c0_11 = arith.constant 0 : index
    %c0_12 = arith.constant 0 : index
    %13 = vector.load %arg6[%c0_11, %c0_12] : memref<1x32xf32, #tpu.memory_space<vmem>>, vector<1x32xf32>
    %14 = vector.broadcast %13 : vector<1x32xf32> to vector<8x32xf32>
    %15 = arith.mulf %12, %14 : vector<8x32xf32>
    %c0_13 = arith.constant 0 : index
    %c0_14 = arith.constant 0 : index
    %16 = vector.load %arg8[%c0_13, %c0_14] : memref<8x32xf32, #tpu.memory_space<vmem>>, vector<8x32xf32>
    tpu.vector_store %arg8[%c0_13, %c0_14], %15 {strides = array<i32>} : memref<8x32xf32, #tpu.memory_space<vmem>>, vector<8x32xf32>,
    return
  }
  func.func @transform_0(%arg0: i32, %arg1: i32) -> (i32, i32) {
    %c0_i32 = arith.constant 0 : i32
    %c0_i32_0 = arith.constant 0 : i32
    return %arg0, %c0_i32 : i32, i32
  }
  func.func @transform_1(%arg0: i32, %arg1: i32) -> (i32, i32) {
    %c0_i32 = arith.constant 0 : i32
    %c0_i32_0 = arith.constant 0 : i32
    return %c0_i32, %arg1 : i32, i32
  }
  func.func @transform_2(%arg0: i32, %arg1: i32) -> (i32, i32) {
    %c0_i32 = arith.constant 0 : i32
    %c0_i32_0 = arith.constant 0 : i32
    return %c0_i32, %arg1 : i32, i32
  }
  func.func @transform_3(%arg0: i32, %arg1: i32) -> (i32, i32) {
    %c0_i32 = arith.constant 0 : i32
    return %arg0, %arg1 : i32, i32
  }
  func.func @transform_4(%arg0: i32, %arg1: i32) -> (i32, i32) {
    %c0_i32 = arith.constant 0 : i32
    %c0_i32_0 = arith.constant 0 : i32
    return %c0_i32, %arg1 : i32, i32
  }
  func.func @transform_5(%arg0: i32, %arg1: i32) -> (i32, i32) {
    %c0_i32 = arith.constant 0 : i32
    return %arg0, %arg1 : i32, i32
  }
  func.func @transform_6(%arg0: i32, %arg1: i32) -> (i32, i32) {
    %c0_i32 = arith.constant 0 : i32
    return %arg0, %arg1 : i32, i32
  }
}

</mosaic_0001>

<bundles_post_ra>
// kernel: tpu_custom_call.1
= control target key start
LH: loop header
LB: loop body
LE: loop exit
PB: predicated region body
PF: predicated region fallthrough
CT: control target
= control target key end

     0   :  { %12 = vsyncpa [#allocation3], 0  ;;  %s415_s0 = inlined_call_operand.vmem [shape: f32[8,32], index: 0, kind: input, shape index: {}]   ;;  %s416_s1 = inlined_call_operand.hbm [shape: f32[32,32], index: 1, kind: input, shape index: {}]   ;;  %s417_s2 = inlined_call_operand.vmem [shape: f32[1,32], index: 2, kind: input, shape index: {}]   ;;  %s418_s3 = inlined_call_operand.hbm [shape: f32[8,32], index: 3, kind: input, shape index: {}, may-alias: {3,6}]   ;;  %s419_s4 = inlined_call_operand.vmem [shape: f32[1,32], index: 4, kind: input, shape index: {}]   ;;  %s420_s5 = inlined_call_operand.hbm [shape: f32[8,32], index: 5, kind: output, shape index: {0}]   ;;  %s421_s6 = inlined_call_operand.hbm [shape: f32[8,32], index: 6, kind: output, shape index: {1}, may-alias: {3,6}]  }
   0x1   :  { %13 = vsyncpa [#allocation6], 0 }
   0x2   :  { %14 = vsyncpa [#allocation4], 0 }
   0x3   :  { %15 = vsyncpa [#allocation9], 0  ;;  %s311_s21 = smov [#allocation2]   ;;  %s215_s25 = scalar_lea.hbm %s416_s1, 512 }
   0x4   :  { %s23_s22 = sshll.u32 %s311_s21, 4  ;;  %p216_p0 = scmp.ne.s32.totalorder %s416_s1, %s215_s25  ;;  %s24_s22 = int_to_ptr.vmem [resolvable:$true] %s23_s22 }
   0x5   :  { %p219_p1 = scmp.lt.u32.totalorder %s215_s25, %s416_s1 }
   0x7   :  { %p221_p2 = pnand %p219_p1, %p216_p0 }
   0x9   :  { %224 = shalt.err (!%p221_p2)
}
   0xa   :  { %s225_s30 = scalar_lea.vmem %s24_s22, 512  ;;  %p230_p4 = scmp.lt.s32.totalorder %s24_s22, %s24_s22 }
   0xb   :  { %p226_p3 = scmp.ne.s32.totalorder %s24_s22, %s225_s30  ;;  %p231_p5 = scmp.lt.s32.totalorder %s225_s30, %s225_s30 }
   0xd   :  { %p232_p6 = por %p231_p5, %p230_p4 }
   0xf   :  { %p233_p7 = pnand %p232_p6, %p226_p3 }
  0x11   :  { %236 = shalt.err (!%p233_p7)
}
  0x12   :  { %s312_s7 = smov 128   ;;  %s313_s8 = smov 8  }
  0x13   :  { %29 = dma.hbm_to_vmem [thread:$0]  %s416_s1, 512, %s24_s22, [#allocation3], %s312_s7, %s312_s7, %s313_s8  }
  0x14   :  { %s314_s11 = smov [#allocation5]   ;;  %s237_s15 = scalar_lea.hbm %s418_s3, 128 }
  0x15   :  { %s38_s12 = sshll.u32 %s314_s11, 4  ;;  %p238_p8 = scmp.ne.s32.totalorder %s418_s3, %s237_s15  ;;  %s39_s12 = int_to_ptr.vmem [resolvable:$true] %s38_s12 }
  0x16   :  { %p241_p9 = scmp.lt.u32.totalorder %s237_s15, %s418_s3 }
  0x18   :  { %p243_p10 = pnand %p241_p9, %p238_p8 }
  0x1a   :  { %246 = shalt.err (!%p243_p10)
}
  0x1b   :  { %s247_s20 = scalar_lea.vmem %s39_s12, 128  ;;  %p252_p12 = scmp.lt.s32.totalorder %s39_s12, %s39_s12 }
  0x1c   :  { %p248_p11 = scmp.ne.s32.totalorder %s39_s12, %s247_s20  ;;  %p253_p13 = scmp.lt.s32.totalorder %s247_s20, %s247_s20 }
  0x1e   :  { %p254_p0 = por %p253_p13, %p252_p12 }
  0x20   :  { %p255_p1 = pnand %p254_p0, %p248_p11 }
  0x22   :  { %258 = shalt.err (!%p255_p1)
}
  0x23   :  { %41 = dma.hbm_to_vmem [thread:$0]  %s418_s3, 128, %s39_s12, [#allocation6]  }
  0x24   :  { %303 = dma.done.wait [#allocation3], 512  }
  0x25   :  { %304 = vsyncadd [#allocation3], 4294966784 }
  0x26   :  { %305 = dma.done.wait [#allocation6], 128  }
  0x27   :  { %306 = vsyncadd [#allocation6], 4294967168  ;;  %v315_v0 = vmov 0.0|0.0   ;;  %vm316_vm0 = vmmov 0   ;;  %v317_v1 = vmov 0.0   ;;  %v51_v2 = vld [vmem:[#allocation2] sm:$0xff] }
  0x28   :  { %200 = vmatprep.subr.bf16.mxu0 %v315_v0  ;;  %197 = vmatprep.mubr.msk.f32.mxu0 %vm316_vm0, %v317_v1  ;;  %v52_v3 = vld [vmem:[#allocation2 + $0x8] sm:$0xff]  ;;  %v53_v4 = vld [vmem:[#allocation2 + $0x10] sm:$0xff]  ;;  %v54_v6 = vld [vmem:[#allocation2 + $0x18] sm:$0xff]  ;;  %vm55_vm1 = vcmask 261120   ;;  %s318_s25 = smov [#allocation7]   ;;  %s319_s29 = smov [#allocation8]  }
  0x29   :  { %v201_v5 = vpack.c.bf16 %v52_v3, %v51_v2  ;;  %v204_v7 = vpack.c.bf16 %v54_v6, %v53_v4  ;;  %v50_v8 = vld [vmem:[%s415_s0] sm:$0xff]  ;;  %s157_s26 = sshll.u32 %s318_s25, 4  ;;  %s167_s0 = sshll.u32 %s319_s29, 4  ;;  %s158_s26 = int_to_ptr.vmem [resolvable:$true] %s157_s26  ;;  %s168_s0 = int_to_ptr.vmem [resolvable:$true] %s167_s0 }
  0x2a   :  { %v129_v9 = vld [vmem:[#allocation5] sm:$0xff]  ;;  %s259_s30 = scalar_lea.vmem %s158_s26, 128  ;;  %p264_p3 = scmp.lt.s32.totalorder %s158_s26, %s158_s26 }
  0x2b   :  { %202 = vmatpush3.bf16.msra.mxu0 %v201_v5  ;;  %v182_v11 = vld [vmem:[%s417_s2] ss:$0 sm:$0xff]  ;;  %p260_p2 = scmp.ne.s32.totalorder %s158_s26, %s259_s30  ;;  %p265_p4 = scmp.lt.s32.totalorder %s259_s30, %s259_s30 }
  0x2c   :  { %203 = vmatprep.subr.bf16.mxu0 %v315_v0  ;;  %v183_v15 = vld [vmem:[%s419_s4] ss:$0 sm:$0xff] }
  0x2d   :  { %p266_p5 = por %p265_p4, %p264_p3 }
  0x2f   :  { %205 = vmatpush3.bf16.msra.mxu0 %v204_v7  ;;  %p267_p6 = pnand %p266_p5, %p260_p2 }
  0x32   :  { %198 = vmatmul.mubr.msk.f32.vlgmr.msra.gmra.mrb[0].mxu0 %vm55_vm1, %v50_v8 }
 0x105   :  { %v125_v10 = vpop.f32.mrb[0].mxu0 }
 0x106   :  { %v130_v12 = vadd.f32 %v129_v9, %v125_v10  ;;  %v199_v13 = vpop.f32.mrb[1].mxu0 }
 0x108   :  { %v138_v14 = vadd.f32 %v182_v11, %v130_v12 }
 0x10a   :  { %v139_v16 = vmax.f32 %v138_v14, 0.0  ;;  %v141_v17 = vmin.f32 %v138_v14, 0.0 }
 0x10c   :  { %140 = vst.msk [vmem:[#allocation7] sm:$0xff] %vm55_vm1, %v139_v16  ;;  %v149_v18 = vmul.f32 %v183_v15, %v141_v17 }
 0x10d   :  { %270 = shalt.err (!%p267_p6)
}
 0x10e   :  { %s271_s4 = scalar_lea.hbm %s420_s5, 128 }
 0x10f   :  { %p272_p7 = scmp.ne.s32.totalorder %s420_s5, %s271_s4  ;;  %p275_p8 = scmp.lt.u32.totalorder %s271_s4, %s420_s5 }
 0x111   :  { %p277_p9 = pnand %p275_p8, %p272_p7 }
 0x113   :  { %280 = shalt.err (!%p277_p9)
}
 0x114   :  { %160 = dma.vmem_to_hbm [thread:$0]  %s158_s26, 128, %s420_s5, [#allocation4]   ;;  %150 = vst.msk [vmem:[#allocation8] sm:$0xff] %vm55_vm1, %v149_v18 }
 0x115   :  { %s281_s14 = scalar_lea.vmem %s168_s0, 128  ;;  %p286_p11 = scmp.lt.s32.totalorder %s168_s0, %s168_s0 }
 0x116   :  { %p282_p10 = scmp.ne.s32.totalorder %s168_s0, %s281_s14  ;;  %p287_p12 = scmp.lt.s32.totalorder %s281_s14, %s281_s14 }
 0x118   :  { %p288_p13 = por %p287_p12, %p286_p11 }
 0x11a   :  { %p289_p0 = pnand %p288_p13, %p282_p10 }
 0x11c   :  { %292 = shalt.err (!%p289_p0)
}
 0x11d   :  { %s293_s17 = scalar_lea.hbm %s421_s6, 128 }
 0x11e   :  { %p294_p1 = scmp.ne.s32.totalorder %s421_s6, %s293_s17  ;;  %p297_p2 = scmp.lt.u32.totalorder %s293_s17, %s421_s6 }
 0x120   :  { %p299_p3 = pnand %p297_p2, %p294_p1 }
 0x122   :  { %302 = shalt.err (!%p299_p3)
}
 0x123   :  { %170 = dma.vmem_to_hbm [thread:$0]  %s168_s0, 128, %s421_s6, [#allocation9]  }
 0x124   :  { %307 = dma.done.wait [#allocation4], 128  }
 0x125   :  { %308 = vsyncadd [#allocation4], 4294967168 }
 0x126   :  { %309 = dma.done.wait [#allocation9], 128  }
 0x127   :  { %310 = vsyncadd [#allocation9], 4294967168 }
 0x128   :  { %177 = vsyncpa [#allocation3], 1 }
 0x129   :  { %178 = vsyncpa [#allocation6], 1 }
 0x12a   :  { %179 = vsyncpa [#allocation4], 1 }
 0x12b   :  { %180 = vsyncpa [#allocation9], 1 }

</bundles_post_ra>
